<compile_context>
chip_gen: v6e
topology: v6e:2x2x1
jax: 0.10.0
libtpu: 0.0.40
codegen_flags: <defaults>
</compile_context>

<pallas_src>
import functools

import jax
import jax.numpy as jnp
from jax.experimental import pallas as pl
from jax.experimental.pallas import tpu as pltpu


def _round_up(x, m):
    return ((x + m - 1) // m) * m


def _fused_causal_conv_kernel(n_layers, k_size, x_ref, *args):
    """One (batch b, time-tile t) grid point of the fused CausalConvBlock.

    x_ref              : (1, C0, T_tile)             input tile (VMEM)
    args[:L]           : per-layer weights, layer l: (K, C_out_l, C_in_l) bf16
    args[L]            : (1, C_last, T_tile)         output tile (VMEM)
    args[L+1] carry_ref: (L * C_max, K-1)            carried left context, bf16
    args[L+2] hx_ref   : (C_max, halo_off + T_tile)  padded layer input, bf16
    args[L+3] acc_ref  : (C_max, T_tile)             f32 layer-output accumulator
    """
    w_refs = args[:n_layers]
    o_ref = args[n_layers]
    carry_ref, hx_ref, acc_ref = args[n_layers + 1:]

    pad = k_size - 1
    t_tile = x_ref.shape[-1]
    c_max = acc_ref.shape[0]
    halo_off = _round_up(pad, 128)        # 128-aligned start of the tile body
    cdt = hx_ref.dtype
    t_idx = pl.program_id(1)

    # First time tile of this batch row: zero every layer's carried causal
    # context (all C_max rows so wider later layers also see a clean halo).
    # Only the (K-1)-wide halo is zeroed -- never a full activation buffer.
    @pl.when(t_idx == 0)
    def _():
        carry_ref[...] = jnp.zeros_like(carry_ref)

    for l in range(n_layers):
        _, c_out, c_in = w_refs[l].shape

        # 1) causal halo: K-1 input columns carried from the previous time tile.
        hx_ref[pl.ds(0, c_in), pl.ds(halo_off - pad, pad)] = (
            carry_ref[pl.ds(l * c_max, c_in), :])

        # 2) tile body (lane-dense, 128-aligned store): this layer's input.
        if l == 0:
            hx_ref[pl.ds(0, c_in), pl.ds(halo_off, t_tile)] = (
                x_ref[0].astype(cdt))
        else:
            hx_ref[pl.ds(0, c_in), pl.ds(halo_off, t_tile)] = (
                acc_ref[pl.ds(0, c_in), :].astype(cdt))

        # 3) save this layer's last K-1 input columns for the next time tile.
        carry_ref[pl.ds(l * c_max, c_in), :] = (
            hx_ref[pl.ds(0, c_in), pl.ds(halo_off + t_tile - pad, pad)])

        # 4) K accumulated shifted matmuls (no im2col materialization):
        #    bf16 operands, f32 accumulate in VMEM scratch.
        #    NOTE: for tiny channel counts (like the demo's 4-8) the MXU is
        #    under-utilized and the kernel is copy-bound; for real WaveNet
        #    widths (>=64 channels) these dots fill the systolic array.
        acc_ref[pl.ds(0, c_out), :] = jnp.dot(
            w_refs[l][0],
            hx_ref[pl.ds(0, c_in), pl.ds(halo_off - pad, t_tile)],
            preferred_element_type=jnp.float32)
        for k in range(1, k_size):
            acc_ref[pl.ds(0, c_out), :] += jnp.dot(
                w_refs[l][k],
                hx_ref[pl.ds(0, c_in), pl.ds(halo_off - pad + k, t_tile)],
                preferred_element_type=jnp.float32)

    c_last = w_refs[-1].shape[1]
    # Emit the output tile directly in (B, C_last, T) layout.
    o_ref[0] = acc_ref[pl.ds(0, c_last), :].astype(o_ref.dtype)


def _pick_time_tile(t_len):
    """Largest lane-dense (multiple-of-128) divisor of T up to 512, else full T."""
    for cand in (512, 256, 128):
        if t_len >= cand and t_len % cand == 0:
            return cand
    return t_len


def causal_conv_block(x, weights, *, compute_dtype=jnp.bfloat16):
    """Forward pass of CausalConvBlock fused into one Pallas kernel.

    x: (B, C0, T) float32.  weights: list of (C_out, C_in, K) arrays (no bias).
    Returns (B, C_last, T) in x.dtype (intermediates computed in bf16 / f32 acc).
    """
    b_sz, c0, t_len = x.shape
    n_layers = len(weights)
    k_size = weights[0].shape[2]
    pad = k_size - 1
    # kernel_size=1 is degenerate in the reference module (x[:, :, :-0] is empty).
    assert k_size >= 2, "kernel_size must be >= 2"

    chans = [c0]
    for w in weights:
        assert w.shape[1] == chans[-1], "channel chaining mismatch"
        assert w.shape[2] == k_size, "all layers must share kernel_size"
        chans.append(w.shape[0])
    c_max = max(chans)
    c_last = chans[-1]

    t_tile = _pick_time_tile(t_len)
    assert t_len % t_tile == 0 and t_tile >= pad
    num_t = t_len // t_tile
    halo_off = _round_up(pad, 128)

    # (C_out, C_in, K) -> (K, C_out, C_in), bf16 for the MXU (f32 accumulate in kernel).
    w3 = [jnp.transpose(w, (2, 0, 1)).astype(compute_dtype) for w in weights]

    kernel = functools.partial(_fused_causal_conv_kernel, n_layers, k_size)

    in_specs = [pl.BlockSpec((1, c0, t_tile), lambda b, t: (b, 0, t))]
    in_specs += [pl.BlockSpec(w.shape, lambda b, t: (0, 0, 0)) for w in w3]

    return pl.pallas_call(
        kernel,
        out_shape=jax.ShapeDtypeStruct((b_sz, c_last, t_len), x.dtype),
        grid=(b_sz, num_t),
        in_specs=in_specs,
        out_specs=pl.BlockSpec((1, c_last, t_tile), lambda b, t: (b, 0, t)),
        scratch_shapes=[
            # per-layer carried (K-1)-column causal context
            pltpu.VMEM((n_layers * c_max, pad), compute_dtype),
            # padded layer-input buffer (body starts at 128-aligned halo_off)
            pltpu.VMEM((c_max, halo_off + t_tile), compute_dtype),
            # f32 accumulator for the current layer's output
            pltpu.VMEM((c_max, t_tile), jnp.float32),
        ],
        compiler_params=pltpu.CompilerParams(
            # batch tiles are independent -> shard across v7x's 2 TCs;
            # time tiles carry state in scratch -> must stay sequential.
            dimension_semantics=("parallel", "arbitrary"),
            vmem_limit_bytes=32 * 1024 * 1024,
        ),
    )(x, *w3)


def init_causal_conv_block_params(key, layers, kernel_size, dtype=jnp.float32):
    """Deterministic weight init; one (C_out, C_in, K) weight per layer, no bias."""
    params = []
    for i in range(len(layers) - 1):
        key, sub = jax.random.split(key)
        c_in, c_out = layers[i], layers[i + 1]
        fan_in = c_in * kernel_size
        scale = 1.0 / jnp.sqrt(fan_in)
        w = jax.random.uniform(sub, (c_out, c_in, kernel_size),
                               minval=-scale, maxval=scale, dtype=dtype)
        params.append(w)
    return params


def _reference_causal_conv_block(x, weights):
    """Pure-JAX f32 reference (lax conv) for correctness check."""
    for w in weights:
        k = w.shape[2]
        pad = k - 1
        x = jax.lax.conv_general_dilated(
            x, w,
            window_strides=(1,),
            padding=[(pad, 0)],
            dimension_numbers=("NCH", "OIH", "NCH"),
        )
    return x


if __name__ == "__main__":
    # Shapes implied by the module: x is (batch, channels=layers[0], time).
    layers = [4, 8, 8, 4]
    kernel_size = 3
    B, T = 2, 16

    key = jax.random.PRNGKey(0)
    key, xkey = jax.random.split(key)
    x = jax.random.normal(xkey, (B, layers[0], T), dtype=jnp.float32)
    weights = init_causal_conv_block_params(key, layers, kernel_size)

    fwd = jax.jit(causal_conv_block)
    out = jax.block_until_ready(fwd(x, weights))

    ref = _reference_causal_conv_block(x, weights)
    assert out.shape == (B, layers[-1], T)
    # Tolerance widened for bf16 activations/weights (f32 accumulation).
    err = float(jnp.max(jnp.abs(out - ref)))
    assert err < 2e-2, err

    print("KERNEL_OK")
</pallas_src>

<mosaic_0001>
module attributes {stable_mosaic.version = 11 : i64} {
  func.func @_fused_causal_conv_kernel(%arg0: i32, %arg1: i32, %arg2: memref<1x4x16xf32, #tpu.memory_space<vmem>>, %arg3: memref<3x8x4xbf16, #tpu.memory_space<vmem>>, %arg4: memref<3x8x8xbf16, #tpu.memory_space<vmem>>, %arg5: memref<3x4x8xbf16, #tpu.memory_space<vmem>>, %arg6: memref<1x4x16xf32, #tpu.memory_space<vmem>>, %arg7: memref<24x2xbf16, #tpu.memory_space<vmem>>, %arg8: memref<8x144xbf16, #tpu.memory_space<vmem>>, %arg9: memref<8x16xf32, #tpu.memory_space<vmem>>) attributes {dimension_semantics = [#tpu.dimension_semantics<parallel>, #tpu.dimension_semantics<arbitrary>], iteration_bounds = array<i64: 2, 1>, scalar_prefetch = 0 : i64, scratch_operands = 3 : i64, tpu.core_type = #tpu.core_type<tc>, window_params = [{transform_indices = @transform_0, window_bounds = array<i64: 1, 4, 16>}, {pipeline_mode = #tpu.pipeline_mode<synchronous>, transform_indices = @transform_1, window_bounds = array<i64: 3, 8, 4>}, {pipeline_mode = #tpu.pipeline_mode<synchronous>, transform_indices = @transform_2, window_bounds = array<i64: 3, 8, 8>}, {pipeline_mode = #tpu.pipeline_mode<synchronous>, transform_indices = @transform_3, window_bounds = array<i64: 3, 4, 8>}, {transform_indices = @transform_4, window_bounds = array<i64: 1, 4, 16>}]} {
    %c0_i32 = arith.constant 0 : i32
    %0 = arith.cmpi eq, %arg1, %c0_i32 : i32
    %1 = arith.extui %0 : i1 to i32
    %c0_i32_0 = arith.constant 0 : i32
    %2 = arith.cmpi ne, %1, %c0_i32_0 : i32
    scf.if %2 {
      %cst_117 = arith.constant 0.000000e+00 : bf16
      %86 = vector.broadcast %cst_117 : bf16 to vector<24x2xbf16>
      %c0_118 = arith.constant 0 : index
      %c0_119 = arith.constant 0 : index
      %87 = vector.load %arg7[%c0_118, %c0_119] : memref<24x2xbf16, #tpu.memory_space<vmem>>, vector<24x2xbf16>
      tpu.vector_store %arg7[%c0_118, %c0_119], %86 {strides = array<i32>} : memref<24x2xbf16, #tpu.memory_space<vmem>>, vector<24x2xbf16>,
    } else {
    }
    %c0 = arith.constant 0 : index
    %c0_1 = arith.constant 0 : index
    %3 = vector.load %arg7[%c0, %c0_1] : memref<24x2xbf16, #tpu.memory_space<vmem>>, vector<4x2xbf16>
    %c0_2 = arith.constant 0 : index
    %c126 = arith.constant 126 : index
    %4 = vector.load %arg8[%c0_2, %c126] : memref<8x144xbf16, #tpu.memory_space<vmem>>, vector<4x2xbf16>
    tpu.vector_store %arg8[%c0_2, %c126], %3 {strides = array<i32>} : memref<8x144xbf16, #tpu.memory_space<vmem>>, vector<4x2xbf16>,
    %c0_3 = arith.constant 0 : index
    %c0_4 = arith.constant 0 : index
    %c0_5 = arith.constant 0 : index
    %5 = vector.load %arg2[%c0_3, %c0_4, %c0_5] : memref<1x4x16xf32, #tpu.memory_space<vmem>>, vector<1x4x16xf32>
    %6 = vector.shape_cast %5 : vector<1x4x16xf32> to vector<4x16xf32>
    %7 = arith.truncf %6 : vector<4x16xf32> to vector<4x16xbf16>
    %c0_6 = arith.constant 0 : index
    %c128 = arith.constant 128 : index
    %8 = vector.load %arg8[%c0_6, %c128] : memref<8x144xbf16, #tpu.memory_space<vmem>>, vector<4x16xbf16>
    tpu.vector_store %arg8[%c0_6, %c128], %7 {strides = array<i32>} : memref<8x144xbf16, #tpu.memory_space<vmem>>, vector<4x16xbf16>,
    %c0_7 = arith.constant 0 : index
    %c142 = arith.constant 142 : index
    %9 = vector.load %arg8[%c0_7, %c142] : memref<8x144xbf16, #tpu.memory_space<vmem>>, vector<4x2xbf16>
    %c0_8 = arith.constant 0 : index
    %c0_9 = arith.constant 0 : index
    %10 = vector.load %arg7[%c0_8, %c0_9] : memref<24x2xbf16, #tpu.memory_space<vmem>>, vector<4x2xbf16>
    tpu.vector_store %arg7[%c0_8, %c0_9], %9 {strides = array<i32>} : memref<24x2xbf16, #tpu.memory_space<vmem>>, vector<4x2xbf16>,
    %c0_10 = arith.constant 0 : index
    %c0_11 = arith.constant 0 : index
    %c0_12 = arith.constant 0 : index
    %11 = vector.load %arg3[%c0_10, %c0_11, %c0_12] : memref<3x8x4xbf16, #tpu.memory_space<vmem>>, vector<1x8x4xbf16>
    %12 = vector.shape_cast %11 : vector<1x8x4xbf16> to vector<8x4xbf16>
    %c0_13 = arith.constant 0 : index
    %c126_14 = arith.constant 126 : index
    %13 = vector.load %arg8[%c0_13, %c126_14] : memref<8x144xbf16, #tpu.memory_space<vmem>>, vector<4x16xbf16>
    %cst = arith.constant dense<0.000000e+00> : vector<8x16xf32>
    %14 = tpu.matmul %12, %13, %cst {dimension_numbers = #tpu.dot_dimension_numbers<[1], [0], [0], [1], [0, 0, 1, 1], [], []>} : vector<8x4xbf16>, vector<4x16xbf16>, vector<8x16xf32> -> vector<8x16xf32>
    %c0_15 = arith.constant 0 : index
    %c0_16 = arith.constant 0 : index
    %15 = vector.load %arg9[%c0_15, %c0_16] : memref<8x16xf32, #tpu.memory_space<vmem>>, vector<8x16xf32>
    tpu.vector_store %arg9[%c0_15, %c0_16], %14 {strides = array<i32>} : memref<8x16xf32, #tpu.memory_space<vmem>>, vector<8x16xf32>,
    %c0_17 = arith.constant 0 : index
    %c0_18 = arith.constant 0 : index
    %16 = vector.load %arg9[%c0_17, %c0_18] : memref<8x16xf32, #tpu.memory_space<vmem>>, vector<8x16xf32>
    %c1 = arith.constant 1 : index
    %c0_19 = arith.constant 0 : index
    %c0_20 = arith.constant 0 : index
    %17 = vector.load %arg3[%c1, %c0_19, %c0_20] : memref<3x8x4xbf16, #tpu.memory_space<vmem>>, vector<1x8x4xbf16>
    %18 = vector.shape_cast %17 : vector<1x8x4xbf16> to vector<8x4xbf16>
    %c0_21 = arith.constant 0 : index
    %c127 = arith.constant 127 : index
    %19 = vector.load %arg8[%c0_21, %c127] : memref<8x144xbf16, #tpu.memory_space<vmem>>, vector<4x16xbf16>
    %cst_22 = arith.constant dense<0.000000e+00> : vector<8x16xf32>
    %20 = tpu.matmul %18, %19, %cst_22 {dimension_numbers = #tpu.dot_dimension_numbers<[1], [0], [0], [1], [0, 0, 1, 1], [], []>} : vector<8x4xbf16>, vector<4x16xbf16>, vector<8x16xf32> -> vector<8x16xf32>
    %21 = arith.addf %16, %20 : vector<8x16xf32>
    %c0_23 = arith.constant 0 : index
    %c0_24 = arith.constant 0 : index
    %22 = vector.load %arg9[%c0_23, %c0_24] : memref<8x16xf32, #tpu.memory_space<vmem>>, vector<8x16xf32>
    tpu.vector_store %arg9[%c0_23, %c0_24], %21 {strides = array<i32>} : memref<8x16xf32, #tpu.memory_space<vmem>>, vector<8x16xf32>,
    %c0_25 = arith.constant 0 : index
    %c0_26 = arith.constant 0 : index
    %23 = vector.load %arg9[%c0_25, %c0_26] : memref<8x16xf32, #tpu.memory_space<vmem>>, vector<8x16xf32>
    %c2 = arith.constant 2 : index
    %c0_27 = arith.constant 0 : index
    %c0_28 = arith.constant 0 : index
    %24 = vector.load %arg3[%c2, %c0_27, %c0_28] : memref<3x8x4xbf16, #tpu.memory_space<vmem>>, vector<1x8x4xbf16>
    %25 = vector.shape_cast %24 : vector<1x8x4xbf16> to vector<8x4xbf16>
    %c0_29 = arith.constant 0 : index
    %c128_30 = arith.constant 128 : index
    %26 = vector.load %arg8[%c0_29, %c128_30] : memref<8x144xbf16, #tpu.memory_space<vmem>>, vector<4x16xbf16>
    %cst_31 = arith.constant dense<0.000000e+00> : vector<8x16xf32>
    %27 = tpu.matmul %25, %26, %cst_31 {dimension_numbers = #tpu.dot_dimension_numbers<[1], [0], [0], [1], [0, 0, 1, 1], [], []>} : vector<8x4xbf16>, vector<4x16xbf16>, vector<8x16xf32> -> vector<8x16xf32>
    %28 = arith.addf %23, %27 : vector<8x16xf32>
    %c0_32 = arith.constant 0 : index
    %c0_33 = arith.constant 0 : index
    %29 = vector.load %arg9[%c0_32, %c0_33] : memref<8x16xf32, #tpu.memory_space<vmem>>, vector<8x16xf32>
    tpu.vector_store %arg9[%c0_32, %c0_33], %28 {strides = array<i32>} : memref<8x16xf32, #tpu.memory_space<vmem>>, vector<8x16xf32>,
    %c8 = arith.constant 8 : index
    %c0_34 = arith.constant 0 : index
    %30 = vector.load %arg7[%c8, %c0_34] : memref<24x2xbf16, #tpu.memory_space<vmem>>, vector<8x2xbf16>
    %c0_35 = arith.constant 0 : index
    %c126_36 = arith.constant 126 : index
    %31 = vector.load %arg8[%c0_35, %c126_36] : memref<8x144xbf16, #tpu.memory_space<vmem>>, vector<8x2xbf16>
    tpu.vector_store %arg8[%c0_35, %c126_36], %30 {strides = array<i32>} : memref<8x144xbf16, #tpu.memory_space<vmem>>, vector<8x2xbf16>,
    %c0_37 = arith.constant 0 : index
    %c0_38 = arith.constant 0 : index
    %32 = vector.load %arg9[%c0_37, %c0_38] : memref<8x16xf32, #tpu.memory_space<vmem>>, vector<8x16xf32>
    %33 = arith.truncf %32 : vector<8x16xf32> to vector<8x16xbf16>
    %c0_39 = arith.constant 0 : index
    %c128_40 = arith.constant 128 : index
    %34 = vector.load %arg8[%c0_39, %c128_40] : memref<8x144xbf16, #tpu.memory_space<vmem>>, vector<8x16xbf16>
    tpu.vector_store %arg8[%c0_39, %c128_40], %33 {strides = array<i32>} : memref<8x144xbf16, #tpu.memory_space<vmem>>, vector<8x16xbf16>,
    %c0_41 = arith.constant 0 : index
    %c142_42 = arith.constant 142 : index
    %35 = vector.load %arg8[%c0_41, %c142_42] : memref<8x144xbf16, #tpu.memory_space<vmem>>, vector<8x2xbf16>
    %c8_43 = arith.constant 8 : index
    %c0_44 = arith.constant 0 : index
    %36 = vector.load %arg7[%c8_43, %c0_44] : memref<24x2xbf16, #tpu.memory_space<vmem>>, vector<8x2xbf16>
    tpu.vector_store %arg7[%c8_43, %c0_44], %35 {strides = array<i32>} : memref<24x2xbf16, #tpu.memory_space<vmem>>, vector<8x2xbf16>,
    %c0_45 = arith.constant 0 : index
    %c0_46 = arith.constant 0 : index
    %c0_47 = arith.constant 0 : index
    %37 = vector.load %arg4[%c0_45, %c0_46, %c0_47] : memref<3x8x8xbf16, #tpu.memory_space<vmem>>, vector<1x8x8xbf16>
    %38 = vector.shape_cast %37 : vector<1x8x8xbf16> to vector<8x8xbf16>
    %c0_48 = arith.constant 0 : index
    %c126_49 = arith.constant 126 : index
    %39 = vector.load %arg8[%c0_48, %c126_49] : memref<8x144xbf16, #tpu.memory_space<vmem>>, vector<8x16xbf16>
    %cst_50 = arith.constant dense<0.000000e+00> : vector<8x16xf32>
    %40 = tpu.matmul %38, %39, %cst_50 {dimension_numbers = #tpu.dot_dimension_numbers<[1], [0], [0], [1], [0, 0, 1, 1], [], []>} : vector<8x8xbf16>, vector<8x16xbf16>, vector<8x16xf32> -> vector<8x16xf32>
    %c0_51 = arith.constant 0 : index
    %c0_52 = arith.constant 0 : index
    %41 = vector.load %arg9[%c0_51, %c0_52] : memref<8x16xf32, #tpu.memory_space<vmem>>, vector<8x16xf32>
    tpu.vector_store %arg9[%c0_51, %c0_52], %40 {strides = array<i32>} : memref<8x16xf32, #tpu.memory_space<vmem>>, vector<8x16xf32>,
    %c0_53 = arith.constant 0 : index
    %c0_54 = arith.constant 0 : index
    %42 = vector.load %arg9[%c0_53, %c0_54] : memref<8x16xf32, #tpu.memory_space<vmem>>, vector<8x16xf32>
    %c1_55 = arith.constant 1 : index
    %c0_56 = arith.constant 0 : index
    %c0_57 = arith.constant 0 : index
    %43 = vector.load %arg4[%c1_55, %c0_56, %c0_57] : memref<3x8x8xbf16, #tpu.memory_space<vmem>>, vector<1x8x8xbf16>
    %44 = vector.shape_cast %43 : vector<1x8x8xbf16> to vector<8x8xbf16>
    %c0_58 = arith.constant 0 : index
    %c127_59 = arith.constant 127 : index
    %45 = vector.load %arg8[%c0_58, %c127_59] : memref<8x144xbf16, #tpu.memory_space<vmem>>, vector<8x16xbf16>
    %cst_60 = arith.constant dense<0.000000e+00> : vector<8x16xf32>
    %46 = tpu.matmul %44, %45, %cst_60 {dimension_numbers = #tpu.dot_dimension_numbers<[1], [0], [0], [1], [0, 0, 1, 1], [], []>} : vector<8x8xbf16>, vector<8x16xbf16>, vector<8x16xf32> -> vector<8x16xf32>
    %47 = arith.addf %42, %46 : vector<8x16xf32>
    %c0_61 = arith.constant 0 : index
    %c0_62 = arith.constant 0 : index
    %48 = vector.load %arg9[%c0_61, %c0_62] : memref<8x16xf32, #tpu.memory_space<vmem>>, vector<8x16xf32>
    tpu.vector_store %arg9[%c0_61, %c0_62], %47 {strides = array<i32>} : memref<8x16xf32, #tpu.memory_space<vmem>>, vector<8x16xf32>,
    %c0_63 = arith.constant 0 : index
    %c0_64 = arith.constant 0 : index
    %49 = vector.load %arg9[%c0_63, %c0_64] : memref<8x16xf32, #tpu.memory_space<vmem>>, vector<8x16xf32>
    %c2_65 = arith.constant 2 : index
    %c0_66 = arith.constant 0 : index
    %c0_67 = arith.constant 0 : index
    %50 = vector.load %arg4[%c2_65, %c0_66, %c0_67] : memref<3x8x8xbf16, #tpu.memory_space<vmem>>, vector<1x8x8xbf16>
    %51 = vector.shape_cast %50 : vector<1x8x8xbf16> to vector<8x8xbf16>
    %c0_68 = arith.constant 0 : index
    %c128_69 = arith.constant 128 : index
    %52 = vector.load %arg8[%c0_68, %c128_69] : memref<8x144xbf16, #tpu.memory_space<vmem>>, vector<8x16xbf16>
    %cst_70 = arith.constant dense<0.000000e+00> : vector<8x16xf32>
    %53 = tpu.matmul %51, %52, %cst_70 {dimension_numbers = #tpu.dot_dimension_numbers<[1], [0], [0], [1], [0, 0, 1, 1], [], []>} : vector<8x8xbf16>, vector<8x16xbf16>, vector<8x16xf32> -> vector<8x16xf32>
    %54 = arith.addf %49, %53 : vector<8x16xf32>
    %c0_71 = arith.constant 0 : index
    %c0_72 = arith.constant 0 : index
    %55 = vector.load %arg9[%c0_71, %c0_72] : memref<8x16xf32, #tpu.memory_space<vmem>>, vector<8x16xf32>
    tpu.vector_store %arg9[%c0_71, %c0_72], %54 {strides = array<i32>} : memref<8x16xf32, #tpu.memory_space<vmem>>, vector<8x16xf32>,
    %c16 = arith.constant 16 : index
    %c0_73 = arith.constant 0 : index
    %56 = vector.load %arg7[%c16, %c0_73] : memref<24x2xbf16, #tpu.memory_space<vmem>>, vector<8x2xbf16>
    %c0_74 = arith.constant 0 : index
    %c126_75 = arith.constant 126 : index
    %57 = vector.load %arg8[%c0_74, %c126_75] : memref<8x144xbf16, #tpu.memory_space<vmem>>, vector<8x2xbf16>
    tpu.vector_store %arg8[%c0_74, %c126_75], %56 {strides = array<i32>} : memref<8x144xbf16, #tpu.memory_space<vmem>>, vector<8x2xbf16>,
    %c0_76 = arith.constant 0 : index
    %c0_77 = arith.constant 0 : index
    %58 = vector.load %arg9[%c0_76, %c0_77] : memref<8x16xf32, #tpu.memory_space<vmem>>, vector<8x16xf32>
    %59 = arith.truncf %58 : vector<8x16xf32> to vector<8x16xbf16>
    %c0_78 = arith.constant 0 : index
    %c128_79 = arith.constant 128 : index
    %60 = vector.load %arg8[%c0_78, %c128_79] : memref<8x144xbf16, #tpu.memory_space<vmem>>, vector<8x16xbf16>
    tpu.vector_store %arg8[%c0_78, %c128_79], %59 {strides = array<i32>} : memref<8x144xbf16, #tpu.memory_space<vmem>>, vector<8x16xbf16>,
    %c0_80 = arith.constant 0 : index
    %c142_81 = arith.constant 142 : index
    %61 = vector.load %arg8[%c0_80, %c142_81] : memref<8x144xbf16, #tpu.memory_space<vmem>>, vector<8x2xbf16>
    %c16_82 = arith.constant 16 : index
    %c0_83 = arith.constant 0 : index
    %62 = vector.load %arg7[%c16_82, %c0_83] : memref<24x2xbf16, #tpu.memory_space<vmem>>, vector<8x2xbf16>
    tpu.vector_store %arg7[%c16_82, %c0_83], %61 {strides = array<i32>} : memref<24x2xbf16, #tpu.memory_space<vmem>>, vector<8x2xbf16>,
    %c0_84 = arith.constant 0 : index
    %c0_85 = arith.constant 0 : index
    %c0_86 = arith.constant 0 : index
    %63 = vector.load %arg5[%c0_84, %c0_85, %c0_86] : memref<3x4x8xbf16, #tpu.memory_space<vmem>>, vector<1x4x8xbf16>
    %64 = vector.shape_cast %63 : vector<1x4x8xbf16> to vector<4x8xbf16>
    %c0_87 = arith.constant 0 : index
    %c126_88 = arith.constant 126 : index
    %65 = vector.load %arg8[%c0_87, %c126_88] : memref<8x144xbf16, #tpu.memory_space<vmem>>, vector<8x16xbf16>
    %cst_89 = arith.constant dense<0.000000e+00> : vector<4x16xf32>
    %66 = tpu.matmul %64, %65, %cst_89 {dimension_numbers = #tpu.dot_dimension_numbers<[1], [0], [0], [1], [0, 0, 1, 1], [], []>} : vector<4x8xbf16>, vector<8x16xbf16>, vector<4x16xf32> -> vector<4x16xf32>
    %c0_90 = arith.constant 0 : index
    %c0_91 = arith.constant 0 : index
    %67 = vector.load %arg9[%c0_90, %c0_91] : memref<8x16xf32, #tpu.memory_space<vmem>>, vector<4x16xf32>
    tpu.vector_store %arg9[%c0_90, %c0_91], %66 {strides = array<i32>} : memref<8x16xf32, #tpu.memory_space<vmem>>, vector<4x16xf32>,
    %c0_92 = arith.constant 0 : index
    %c0_93 = arith.constant 0 : index
    %68 = vector.load %arg9[%c0_92, %c0_93] : memref<8x16xf32, #tpu.memory_space<vmem>>, vector<4x16xf32>
    %c1_94 = arith.constant 1 : index
    %c0_95 = arith.constant 0 : index
    %c0_96 = arith.constant 0 : index
    %69 = vector.load %arg5[%c1_94, %c0_95, %c0_96] : memref<3x4x8xbf16, #tpu.memory_space<vmem>>, vector<1x4x8xbf16>
    %70 = vector.shape_cast %69 : vector<1x4x8xbf16> to vector<4x8xbf16>
    %c0_97 = arith.constant 0 : index
    %c127_98 = arith.constant 127 : index
    %71 = vector.load %arg8[%c0_97, %c127_98] : memref<8x144xbf16, #tpu.memory_space<vmem>>, vector<8x16xbf16>
    %cst_99 = arith.constant dense<0.000000e+00> : vector<4x16xf32>
    %72 = tpu.matmul %70, %71, %cst_99 {dimension_numbers = #tpu.dot_dimension_numbers<[1], [0], [0], [1], [0, 0, 1, 1], [], []>} : vector<4x8xbf16>, vector<8x16xbf16>, vector<4x16xf32> -> vector<4x16xf32>
    %73 = arith.addf %68, %72 : vector<4x16xf32>
    %c0_100 = arith.constant 0 : index
    %c0_101 = arith.constant 0 : index
    %74 = vector.load %arg9[%c0_100, %c0_101] : memref<8x16xf32, #tpu.memory_space<vmem>>, vector<4x16xf32>
    tpu.vector_store %arg9[%c0_100, %c0_101], %73 {strides = array<i32>} : memref<8x16xf32, #tpu.memory_space<vmem>>, vector<4x16xf32>,
    %c0_102 = arith.constant 0 : index
    %c0_103 = arith.constant 0 : index
    %75 = vector.load %arg9[%c0_102, %c0_103] : memref<8x16xf32, #tpu.memory_space<vmem>>, vector<4x16xf32>
    %c2_104 = arith.constant 2 : index
    %c0_105 = arith.constant 0 : index
    %c0_106 = arith.constant 0 : index
    %76 = vector.load %arg5[%c2_104, %c0_105, %c0_106] : memref<3x4x8xbf16, #tpu.memory_space<vmem>>, vector<1x4x8xbf16>
    %77 = vector.shape_cast %76 : vector<1x4x8xbf16> to vector<4x8xbf16>
    %c0_107 = arith.constant 0 : index
    %c128_108 = arith.constant 128 : index
    %78 = vector.load %arg8[%c0_107, %c128_108] : memref<8x144xbf16, #tpu.memory_space<vmem>>, vector<8x16xbf16>
    %cst_109 = arith.constant dense<0.000000e+00> : vector<4x16xf32>
    %79 = tpu.matmul %77, %78, %cst_109 {dimension_numbers = #tpu.dot_dimension_numbers<[1], [0], [0], [1], [0, 0, 1, 1], [], []>} : vector<4x8xbf16>, vector<8x16xbf16>, vector<4x16xf32> -> vector<4x16xf32>
    %80 = arith.addf %75, %79 : vector<4x16xf32>
    %c0_110 = arith.constant 0 : index
    %c0_111 = arith.constant 0 : index
    %81 = vector.load %arg9[%c0_110, %c0_111] : memref<8x16xf32, #tpu.memory_space<vmem>>, vector<4x16xf32>
    tpu.vector_store %arg9[%c0_110, %c0_111], %80 {strides = array<i32>} : memref<8x16xf32, #tpu.memory_space<vmem>>, vector<4x16xf32>,
    %c0_112 = arith.constant 0 : index
    %c0_113 = arith.constant 0 : index
    %82 = vector.load %arg9[%c0_112, %c0_113] : memref<8x16xf32, #tpu.memory_space<vmem>>, vector<4x16xf32>
    %c0_114 = arith.constant 0 : index
    %c0_115 = arith.constant 0 : index
    %c0_116 = arith.constant 0 : index
    %83 = vector.load %arg6[%c0_114, %c0_115, %c0_116] : memref<1x4x16xf32, #tpu.memory_space<vmem>>, vector<1x4x16xf32>
    %84 = vector.shape_cast %83 : vector<1x4x16xf32> to vector<4x16xf32>
    %85 = vector.shape_cast %82 : vector<4x16xf32> to vector<1x4x16xf32>
    tpu.vector_store %arg6[%c0_114, %c0_115, %c0_116], %85 {strides = array<i32>} : memref<1x4x16xf32, #tpu.memory_space<vmem>>, vector<1x4x16xf32>,
    return
  }
  func.func @transform_0(%arg0: i32, %arg1: i32) -> (i32, i32, i32) {
    %c0_i32 = arith.constant 0 : i32
    %c0_i32_0 = arith.constant 0 : i32
    return %arg0, %c0_i32, %arg1 : i32, i32, i32
  }
  func.func @transform_1(%arg0: i32, %arg1: i32) -> (i32, i32, i32) {
    %c0_i32 = arith.constant 0 : i32
    %c0_i32_0 = arith.constant 0 : i32
    %c0_i32_1 = arith.constant 0 : i32
    %c0_i32_2 = arith.constant 0 : i32
    return %c0_i32, %c0_i32_0, %c0_i32_1 : i32, i32, i32
  }
  func.func @transform_2(%arg0: i32, %arg1: i32) -> (i32, i32, i32) {
    %c0_i32 = arith.constant 0 : i32
    %c0_i32_0 = arith.constant 0 : i32
    %c0_i32_1 = arith.constant 0 : i32
    %c0_i32_2 = arith.constant 0 : i32
    return %c0_i32, %c0_i32_0, %c0_i32_1 : i32, i32, i32
  }
  func.func @transform_3(%arg0: i32, %arg1: i32) -> (i32, i32, i32) {
    %c0_i32 = arith.constant 0 : i32
    %c0_i32_0 = arith.constant 0 : i32
    %c0_i32_1 = arith.constant 0 : i32
    %c0_i32_2 = arith.constant 0 : i32
    return %c0_i32, %c0_i32_0, %c0_i32_1 : i32, i32, i32
  }
  func.func @transform_4(%arg0: i32, %arg1: i32) -> (i32, i32, i32) {
    %c0_i32 = arith.constant 0 : i32
    %c0_i32_0 = arith.constant 0 : i32
    return %arg0, %c0_i32, %arg1 : i32, i32, i32
  }
}

</mosaic_0001>

<bundles_post_ra>
// kernel: causal_conv_block.1
= control target key start
LH: loop header
LB: loop body
LE: loop exit
PB: predicated region body
PF: predicated region fallthrough
CT: control target
= control target key end

     0   :  { %9 = vsyncpa [#allocation6], 0  ;;  %s1403_s0 = inlined_call_operand.vmem [shape: f32[2,4,16], index: 0, kind: input, shape index: {}]   ;;  %s1404_s1 = inlined_call_operand.vmem [shape: bf16[3,8,4], index: 1, kind: input, shape index: {}]   ;;  %s1405_s2 = inlined_call_operand.vmem [shape: bf16[3,8,8], index: 2, kind: input, shape index: {}]   ;;  %s1406_s3 = inlined_call_operand.vmem [shape: bf16[3,4,8], index: 3, kind: input, shape index: {}]   ;;  %s1407_s4 = inlined_call_operand.hbm [shape: f32[2,4,16], index: 4, kind: output, shape index: {}]  }
   0x1   :  { %11 = vsyncpa [#allocation6 + $0x1], 0  ;;  %s1183_s15 = smov 0   ;;  %s1185_s16 = smov 0  }
   0x2   :  { %s1187_s17 = smov 0   ;;  %s1189_s18 = smov 0  }
   0x3   :  { %s1191_s19 = smov 0   ;;  %s1193_s20 = smov 0  }
   0x4 LB: > { %s892_s21 = sadd.s32 4294967295, %s1148_s20   ;;  %s893_s22 = sadd.s32 4294967294, %s1148_s20   ;;  %s1148_s20 = sphi %s1193_s20, %s17_s20   ;;  %s1144_s19 = sphi %s1191_s19, %s1414_s19   ;;  %s1140_s18 = sphi %s1189_s18, %s1413_s18   ;;  %s1136_s17 = sphi %s1187_s17, %s1412_s17   ;;  %s1132_s16 = sphi %s1185_s16, %s1411_s16   ;;  %s1128_s15 = sphi %s1183_s15, %s1410_s15  }
   0x5   : > { %s29_s23 = sadd.s32 1, %s1144_s19  ;;  %s129_s24 = sadd.s32 1, %s1136_s17 }
   0x6   : > { %p31_p0 = scmp.ge.s32.totalorder %s29_s23, 2  ;;  %p139_p1 = scmp.ne.s32.totalorder %s1136_s17, %s1132_s16 }
   0x7   : > { %p140_p2 = scmp.eq.s32.totalorder %s892_s21, 1  ;;  %p145_p3 = scmp.ne.s32.totalorder %s1132_s16, %s1128_s15 }
   0x8   : > { %s1416_s23 = smov (%p31_p0, %s29_s23), 0  ;;  %p146_p5 = scmp.eq.s32.totalorder %s893_s22, 1 }
   0x9   : > { %p1223_p4 = por %p140_p2, %p139_p1  ;;  %s124_s26 = ssub.s32 %s1144_s19, %s1416_s23 }
   0xa   : > { %p896_p6 = scmp.ge.s32.totalorder %s1148_s20, 1  ;;  %p127_p7 = scmp.eq.s32.totalorder %s124_s26, 0 }
   0xb   : > { %p1230_p8 = por %p146_p5, %p145_p3  ;;  %p183_p9 = scmp.lt.s32.totalorder %s1148_s20, 3 }
   0xc   : > { %s1236_s28 = scalar_select %p127_p7, %s1136_s17, %s129_s24  }
   0xd   : > { %p184_p10 = pnand %p896_p6, %p183_p9 }
   0xe   : > { %p211_p11 = scmp.lt.s32.totalorder (!%p184_p10), %s1140_s18, 1  ;;  %s1151_s8 = smov (!%p184_p10), 126  }
   0xf   : > { %187 = sbr.rel (%p184_p10) target bundleno = 1214 (0x4be), region = 36  ;;  %s1154_s9 = smov (!%p184_p10), 2  }
  0x10   : > { %s1155_s10 = smov (!%p184_p10), 1   ;;  %s208_s14 = sand.u32 (!%p184_p10), 1, %s1132_s16  }
  0x11   : > { %s897_s21 = sshll.u32 (!%p184_p10), %s208_s14, 2  ;;  %s927_s22 = sshll.u32 (!%p184_p10), %s1140_s18, 6 }
  0x12   : > { %s210_s24 = scalar_lea.vmem (!%p184_p10), [#allocation5], %s897_s21  ;;  %s1362_s5 = scalar_lea.hbm (!%p184_p10), %s1407_s4, %s927_s22 }
  0x13   : > { %s821_s26 = sshll.u32 (!%p184_p10), %s210_s24, 4  ;;  %s807_s6 = scalar_lea.sflag (!%p184_p10), [#allocation6], %s208_s14  ;;  %s822_s26 = int_to_ptr.vmem [resolvable:$true] %s821_s26 }
  0x14   : > { %vm223_vm0 = vcmask 11264   ;;  %v1150_v0 = vmov 0   ;;  %s212_s29 = scalar_select %p211_p11, %s1140_s18, 1  ;;  %vm236_vm1 = vcmask 123904   ;;  %vm232_vm2 = vcmask 1042416  }
  0x15   : > { %224 = vst.msk [vmem:[#allocation2] sm:$0xf] %vm223_vm0, %v1150_v0  ;;  %225 = vst.msk [vmem:[#allocation2 + $0x4] sm:$0xf] %vm223_vm0, %v1150_v0  ;;  %v1152_v4 = vmov 0.0   ;;  %vm1153_vm3 = vmmov 0  }
  0x16   : > { %226 = vst.msk [vmem:[#allocation2 + $0x8] sm:$0xf] %vm223_vm0, %v1150_v0  ;;  %s898_s30 = sshll.u32 %s212_s29, 2  ;;  %948 = vmatprep.subr.bf16.mxu0 %v1152_v4  ;;  %954 = vmatprep.subr.bf16.mxu1 %v1152_v4  ;;  %vm256_vm4 = vcmask 15360   ;;  %vm262_vm5 = vcmask 1041408   ;;  %vm321_vm6 = vcmask 7168  }
  0x17   : > { %s217_s7 = scalar_lea.vmem %s1403_s0, %s898_s30  ;;  %950 = vmatprep.mubr.msk.bf16.mxu0 %vm1153_vm3, %v1152_v4  ;;  %956 = vmatprep.mubr.msk.bf16.mxu1 %vm1153_vm3, %v1152_v4  ;;  %v245_v18 = vld [vmem:[%s1404_s1] sm:$0xf]  ;;  %vm258_vm7 = vcmask 31744   ;;  %v902_v24 = vld [vmem:[%s1404_s1 + $0x4] sm:$0xf]  ;;  %vm428_vm8 = vcmask 1044464  }
  0x18   : > { %v234_v1 = vld [vmem:[%s217_s7] sm:$0xf]  ;;  %v906_v25 = vld [vmem:[%s1404_s1 + $0x8] sm:$0xf]  ;;  %vm306_vm9 = vcmask 130048   ;;  %vm432_vm10 = vcmask 125952  }
  0x19   : > { %v235_v2 = vpack.c.bf16 %v234_v1, %v234_v1  ;;  %vm457_vm11 = vcmask 1043456   ;;  %v441_v54 = vld [vmem:[%s1405_s2] sm:$0xf]  ;;  %vm453_vm12 = vcmask 64512   ;;  %v911_v61 = vld [vmem:[%s1405_s2 + $0x4] sm:$0xf] }
  0x1a   : > { %v915_v62 = vld [vmem:[%s1405_s2 + $0x8] sm:$0xf]  ;;  %s1156_s7 = smov 114   ;;  %vm243_vm13 = vcmask 9216  }
  0x1b   : > { %237 = vst.msk [vmem:[#allocation3 + $0x4] sm:$0x3] %vm236_vm1, %v235_v2 }
  0x1c   : > { %v227_v3 = vld [vmem:[#allocation2] sm:$0x3]  ;;  %v423_v12 = vld [vmem:[#allocation2 + $0x4] sm:$0xf] }
  0x1d   : > { %229 = vrot.lane.b32.xlu0 %v227_v3, %s1151_s8  ;;  %v616_v49 = vld [vmem:[#allocation2 + $0x8] sm:$0xf] }
  0x22   : > { %v374_v16 = vld [vmem:[#allocation3 + $0x4] sm:$0x3] }
  0x23   : > { %v379_v21 = vsel %vm262_vm5, %v374_v16, 0  ;;  %v1288_v44 = vld [vmem:[#allocation3 + $0x4] sm:$0x3] }
  0x8f   : > { %v230_v5 = vpop.permute.xlu0 %229 }
  0x90   : > { %233 = vst.msk [vmem:[#allocation3] sm:$0x3] %vm232_vm2, %v230_v5 }
  0x97   : > { %v246_v6 = vld [vmem:[#allocation3] sm:$0x33] }
  0x98   : > { %v900_v7 = vcombine.high %v246_v6, %v246_v6  ;;  %v899_v8 = vcombine.low %v246_v6, %v246_v6  ;;  %v311_v9 = vld [vmem:[#allocation3] sm:$0x33] }
  0x99   : > { %v903_v10 = vcombine.low %v311_v9, %v311_v9  ;;  %v904_v11 = vcombine.high %v311_v9, %v311_v9 }
  0x9a   : > { %254 = vrot.lane.b32.xlu1 %v900_v7, %s1154_s9  ;;  %252 = vrot.lane.b32.xlu0 %v899_v8, %s1154_s9 }
  0x9e   : > { %317 = vrot.lane.b32.xlu1 %v903_v10, %s1155_s10  ;;  %319 = vrot.lane.b32.xlu0 %v904_v11, %s1155_s10 }
  0xa2   : > { %425 = vrot.lane.b32.xlu1 %v423_v12, %s1151_s8 }
 0x10c   : > { %v255_v13 = vpop.permute.xlu1 %254  ;;  %v253_v14 = vpop.permute.xlu0 %252 }
 0x10d   : > { %v257_v15 = vsel %vm256_vm4, %v253_v14, %v255_v13 }
 0x10e   : > { %v264_v17 = vsel %vm262_vm5, %v257_v15, 0 }
 0x10f   : > { %949 = vmatpush3.bf16.msra.mxu0 %v264_v17 }
 0x110   : > { %v318_v19 = vpop.permute.xlu1 %317  ;;  %v320_v20 = vpop.permute.xlu0 %319  ;;  %960 = vmatprep.subr.bf16.mxu0 %v1152_v4 }
 0x111   : > { %v322_v22 = vsel %vm321_vm6, %v318_v19, %v320_v20 }
 0x112   : > { %951 = vmatmul.mubr.msk.bf16.vlgmr.msra.gmra.mxu0 %vm258_vm7, %v245_v18  ;;  %v327_v23 = vsel %vm262_vm5, %v322_v22, 0 }
 0x113   : > { %955 = vmatpush3.bf16.msra.mxu1 %v327_v23  ;;  %961 = vmatpush3.bf16.msra.mxu0 %v379_v21 }
 0x114   : > { %962 = vmatprep.mubr.msk.bf16.mxu0 %vm1153_vm3, %v1152_v4  ;;  %966 = vmatprep.subr.bf16.mxu1 %v1152_v4  ;;  %v426_v26 = vpop.permute.xlu1 %425 }
 0x115   : > { %972 = vmatprep.subr.bf16.mxu0 %v1152_v4  ;;  %429 = vst.msk [vmem:[#allocation3] sm:$0xf] %vm428_vm8, %v426_v26 }
 0x116   : > { %957 = vmatmul.mubr.msk.bf16.vlgmr.msra.gmra.mxu1 %vm258_vm7, %v902_v24 }
 0x117   : > { %968 = vmatprep.mubr.msk.bf16.mxu1 %vm1153_vm3, %v1152_v4 }
 0x11a   : > { %963 = vmatmul.mubr.msk.bf16.vlgmr.msra.gmra.mxu0 %vm258_vm7, %v906_v25 }
 0x11b   : > { %974 = vmatprep.mubr.msk.bf16.mxu0 %vm1153_vm3, %v1152_v4 }
 0x1d2   : > { %v300_v27 = vpop.f32.mrf.mxu0 }
 0x1d3   : > { %307 = vst.msk [vmem:[#allocation4] sm:$0xff] %vm306_vm9, %v300_v27 }
 0x1d4   : > { %v952_v28 = vpop.f32.mrf.mxu0 }
 0x1d5   : > { %v631_v28 = vld [vmem:[%s1406_s3] sm:$0x3] }
 0x1d6   : > { %v303_v29 = vpop.f32.mrf.mxu0  ;;  %v363_v30 = vpop.f32.mrf.mxu1 }
 0x1d8   : > { %v953_v31 = vpop.f32.mrf.mxu0  ;;  %v958_v32 = vpop.f32.mrf.mxu1 }
 0x1da   : > { %v308_v33 = vld [vmem:[#allocation4] sm:$0xff]  ;;  %v366_v34 = vpop.f32.mrf.mxu1  ;;  %v415_v35 = vpop.f32.mrf.mxu0 }
 0x1db   : > { %v369_v36 = vadd.f32 %v363_v30, %v308_v33 }
 0x1dc   : > { %v959_v37 = vpop.f32.mrf.mxu1  ;;  %v964_v38 = vpop.f32.mrf.mxu0 }
 0x1dd   : > { %370 = vst.msk [vmem:[#allocation4] sm:$0xff] %vm306_vm9, %v369_v36  ;;  %v924_v38 = vld [vmem:[%s1406_s3 + $0x4] sm:$0x3] }
 0x1de   : > { %v418_v39 = vpop.f32.mrf.mxu0 }
 0x1e0   : > { %v965_v40 = vpop.f32.mrf.mxu0 }
 0x1e4   : > { %v371_v41 = vld [vmem:[#allocation4] sm:$0xff] }
 0x1e5   : > { %v421_v42 = vadd.f32 %v415_v35, %v371_v41  ;;  %v920_v35 = vld [vmem:[%s1406_s3 + $0x2] sm:$0x3] }
 0x1e7   : > { %422 = vst.msk [vmem:[#allocation4] sm:$0xff] %vm306_vm9, %v421_v42 }
 0x1ee   : > { %v430_v43 = vld [vmem:[#allocation4] sm:$0xff] }
 0x1ef   : > { %v431_v45 = vpack.c.bf16 %v430_v43, %v430_v43 }
 0x1f1   : > { %433 = vst.msk [vmem:[#allocation3 + $0x4] sm:$0xf] %vm432_vm10, %v431_v45 }
 0x1f8   : > { %v442_v46 = vld [vmem:[#allocation3] sm:$0xff] }
 0x1f9   : > { %v909_v47 = vcombine.high %v442_v46, %v442_v46  ;;  %v908_v48 = vcombine.low %v442_v46, %v442_v46  ;;  %v567_v55 = vld [vmem:[#allocation3 + $0x4] sm:$0xf] }
 0x1fa   : > { %v572_v60 = vsel %vm457_vm11, %v567_v55, 0  ;;  %v434_v19 = vld [vmem:[#allocation3 + $0x4] sm:$0xf] }
 0x1fb   : > { %450 = vrot.lane.b32.xlu1 %v909_v47, %s1154_s9  ;;  %448 = vrot.lane.b32.xlu0 %v908_v48, %s1154_s9 }
 0x1ff   : > { %513 = vrot.lane.b32.xlu1 %v909_v47, %s1155_s10  ;;  %511 = vrot.lane.b32.xlu0 %v908_v48, %s1155_s10 }
 0x203   : > { %618 = vrot.lane.b32.xlu0 %v616_v49, %s1151_s8  ;;  %s1157_s8 = smov [#allocation5]  }
 0x204   : > { %s1076_s11 = sshll.u32 %s1157_s8, 4  ;;  %s1077_s11 = int_to_ptr.vmem [resolvable:$false] %s1076_s11 }
 0x205   : > { %s1078_s18 = scalar_lea.vmem %s1077_s11, 128  ;;  %p1079_p1 = scmp.lt.s32.totalorder %s822_s26, %s1077_s11 }
 0x26d   : > { %v451_v50 = vpop.permute.xlu1 %450  ;;  %v449_v51 = vpop.permute.xlu0 %448 }
 0x26e   : > { %v452_v52 = vsel %vm256_vm4, %v449_v51, %v451_v50 }
 0x26f   : > { %v459_v53 = vsel %vm457_vm11, %v452_v52, 0 }
 0x270   : > { %967 = vmatpush3.bf16.msra.mxu1 %v459_v53 }
 0x271   : > { %v514_v56 = vpop.permute.xlu1 %513  ;;  %v512_v57 = vpop.permute.xlu0 %511  ;;  %978 = vmatprep.subr.bf16.mxu1 %v1152_v4 }
 0x272   : > { %v515_v58 = vsel %vm321_vm6, %v512_v57, %v514_v56 }
 0x273   : > { %v520_v59 = vsel %vm457_vm11, %v515_v58, 0  ;;  %969 = vmatmul.mubr.msk.bf16.vlgmr.msra.gmra.mxu1 %vm453_vm12, %v441_v54 }
 0x274   : > { %973 = vmatpush3.bf16.msra.mxu0 %v520_v59  ;;  %979 = vmatpush3.bf16.msra.mxu1 %v572_v60 }
 0x275   : > { %980 = vmatprep.mubr.msk.bf16.mxu1 %vm1153_vm3, %v1152_v4  ;;  %984 = vmatprep.subr.bf16.mxu0 %v1152_v4  ;;  %v619_v63 = vpop.permute.xlu0 %618 }
 0x276   : > { %990 = vmatprep.subr.bf16.mxu1 %v1152_v4  ;;  %621 = vst.msk [vmem:[#allocation3] sm:$0xf] %vm428_vm8, %v619_v63 }
 0x277   : > { %975 = vmatmul.mubr.msk.bf16.vlgmr.msra.gmra.mxu0 %vm453_vm12, %v911_v61 }
 0x278   : > { %986 = vmatprep.mubr.msk.bf16.mxu0 %vm1153_vm3, %v1152_v4 }
 0x27b   : > { %981 = vmatmul.mubr.msk.bf16.vlgmr.msra.gmra.mxu1 %vm453_vm12, %v915_v62 }
 0x27c   : > { %992 = vmatprep.mubr.msk.bf16.mxu1 %vm1153_vm3, %v1152_v4 }
 0x333   : > { %v495_v0 = vpop.f32.mrf.mxu1 }
 0x334   : > { %501 = vst.msk [vmem:[#allocation4] sm:$0xff] %vm306_vm9, %v495_v0 }
 0x335   : > { %v970_v1 = vpop.f32.mrf.mxu1 }
 0x337   : > { %v498_v2 = vpop.f32.mrf.mxu1  ;;  %v556_v3 = vpop.f32.mrf.mxu0 }
 0x339   : > { %v971_v5 = vpop.f32.mrf.mxu1  ;;  %v976_v6 = vpop.f32.mrf.mxu0 }
 0x33b   : > { %v502_v7 = vld [vmem:[#allocation4] sm:$0xff]  ;;  %v559_v8 = vpop.f32.mrf.mxu0  ;;  %v608_v9 = vpop.f32.mrf.mxu1 }
 0x33c   : > { %v562_v10 = vadd.f32 %v556_v3, %v502_v7 }
 0x33d   : > { %v977_v11 = vpop.f32.mrf.mxu0  ;;  %v982_v12 = vpop.f32.mrf.mxu1 }
 0x33e   : > { %563 = vst.msk [vmem:[#allocation4] sm:$0xff] %vm306_vm9, %v562_v10 }
 0x33f   : > { %v611_v13 = vpop.f32.mrf.mxu1 }
 0x341   : > { %v983_v14 = vpop.f32.mrf.mxu1 }
 0x345   : > { %v564_v15 = vld [vmem:[#allocation4] sm:$0xff] }
 0x346   : > { %v614_v16 = vadd.f32 %v608_v9, %v564_v15 }
 0x348   : > { %615 = vst.msk [vmem:[#allocation4] sm:$0xff] %vm306_vm9, %v614_v16 }
 0x34f   : > { %v622_v17 = vld [vmem:[#allocation4] sm:$0xff] }
 0x350   : > { %v623_v18 = vpack.c.bf16 %v622_v17, %v622_v17 }
 0x352   : > { %624 = vst.msk [vmem:[#allocation3 + $0x4] sm:$0xf] %vm432_vm10, %v623_v18 }
 0x359   : > { %v632_v20 = vld [vmem:[#allocation3] sm:$0xff] }
 0x35a   : > { %v918_v21 = vcombine.high %v632_v20, %v632_v20  ;;  %v917_v22 = vcombine.low %v632_v20, %v632_v20  ;;  %v625_v23 = vld [vmem:[#allocation3 + $0x4] sm:$0xf] }
 0x35b   : > { %v755_v29 = vld [vmem:[#allocation3 + $0x4] sm:$0xf] }
 0x35c   : > { %640 = vrot.lane.b32.xlu0 %v918_v21, %s1154_s9  ;;  %638 = vrot.lane.b32.xlu1 %v917_v22, %s1154_s9  ;;  %v760_v34 = vsel %vm457_vm11, %v755_v29, 0 }
 0x360   : > { %701 = vrot.lane.b32.xlu0 %v918_v21, %s1155_s10  ;;  %699 = vrot.lane.b32.xlu1 %v917_v22, %s1155_s10 }
 0x364   : > { %436 = vrot.lane.b32.xlu0 %v434_v19, %s1156_s7  ;;  %240 = vrot.lane.b32.xlu1 %v1288_v44, %s1156_s7 }
 0x368   : > { %627 = vrot.lane.b32.xlu1 %v625_v23, %s1156_s7  ;;  %s1072_s7 = scalar_lea.vmem %s822_s26, 64 }
 0x369   : > { %p1073_p12 = scmp.ne.s32.totalorder %s822_s26, %s1072_s7  ;;  %p1080_p2 = scmp.lt.s32.totalorder %s1078_s18, %s1072_s7 }
 0x36b   : > { %p1074_p13 = pnand %p1073_p12, %p1223_p4  ;;  %p1081_p3 = por %p1080_p2, %p1079_p1 }
 0x36d   : > { %p1075_p0 = pneg %p1074_p13 }
 0x36f   : > { %p1082_p5 = pnand %p1081_p3, %p1075_p0 }
 0x3ce   : > { %v641_v24 = vpop.permute.xlu0 %640  ;;  %v639_v25 = vpop.permute.xlu1 %638 }
 0x3cf   : > { %v642_v26 = vsel %vm256_vm4, %v639_v25, %v641_v24 }
 0x3d0   : > { %v647_v27 = vsel %vm457_vm11, %v642_v26, 0 }
 0x3d1   : > { %985 = vmatpush3.bf16.msra.mxu0 %v647_v27 }
 0x3d2   : > { %v702_v30 = vpop.permute.xlu0 %701  ;;  %v700_v31 = vpop.permute.xlu1 %699  ;;  %996 = vmatprep.subr.bf16.mxu0 %v1152_v4 }
 0x3d3   : > { %v703_v32 = vsel %vm321_vm6, %v700_v31, %v702_v30 }
 0x3d4   : > { %v708_v33 = vsel %vm457_vm11, %v703_v32, 0  ;;  %987 = vmatmul.mubr.msk.bf16.vlgmr.msra.gmra.mxu0 %vm453_vm12, %v631_v28 }
 0x3d5   : > { %991 = vmatpush3.bf16.msra.mxu1 %v708_v33  ;;  %997 = vmatpush3.bf16.msra.mxu0 %v760_v34 }
 0x3d6   : > { %v437_v36 = vpop.permute.xlu0 %436  ;;  %v241_v37 = vpop.permute.xlu1 %240  ;;  %998 = vmatprep.mubr.msk.bf16.mxu0 %vm1153_vm3, %v1152_v4 }
 0x3d7   : > { %440 = vst.msk [vmem:[#allocation2 + $0x4] sm:$0xf] %vm223_vm0, %v437_v36 }
 0x3d8   : > { %244 = vst.msk [vmem:[#allocation2] sm:$0x3] %vm243_vm13, %v241_v37  ;;  %993 = vmatmul.mubr.msk.bf16.vlgmr.msra.gmra.mxu1 %vm453_vm12, %v920_v35 }
 0x3da   : > { %v628_v39 = vpop.permute.xlu1 %627 }
 0x3db   : > { %630 = vst.msk [vmem:[#allocation2 + $0x8] sm:$0xf] %vm223_vm0, %v628_v39 }
 0x3dc   : > { %999 = vmatmul.mubr.msk.bf16.vlgmr.msra.gmra.mxu0 %vm453_vm12, %v924_v38 }
 0x494   : > { %v683_v40 = vpop.f32.mrf.mxu0 }
 0x495   : > { %689 = vst.msk [vmem:[#allocation4] sm:$0xf] %vm432_vm10, %v683_v40 }
 0x496   : > { %v988_v41 = vpop.f32.mrf.mxu0 }
 0x498   : > { %v686_v4 = vpop.f32.mrf.mxu0  ;;  %v744_v42 = vpop.f32.mrf.mxu1 }
 0x49a   : > { %v989_v43 = vpop.f32.mrf.mxu0  ;;  %v994_v44 = vpop.f32.mrf.mxu1 }
 0x49c   : > { %v690_v45 = vld [vmem:[#allocation4] sm:$0xf]  ;;  %v747_v46 = vpop.f32.mrf.mxu1  ;;  %v796_v47 = vpop.f32.mrf.mxu0 }
 0x49d   : > { %v750_v48 = vadd.f32 %v744_v42, %v690_v45 }
 0x49e   : > { %v995_v49 = vpop.f32.mrf.mxu1  ;;  %v1000_v50 = vpop.f32.mrf.mxu0 }
 0x49f   : > { %751 = vst.msk [vmem:[#allocation4] sm:$0xf] %vm432_vm10, %v750_v48 }
 0x4a0   : > { %v799_v51 = vpop.f32.mrf.mxu0 }
 0x4a2   : > { %v1001_v52 = vpop.f32.mrf.mxu0 }
 0x4a6   : > { %v752_v53 = vld [vmem:[#allocation4] sm:$0xf] }
 0x4a7   : > { %v802_v54 = vadd.f32 %v796_v47, %v752_v53 }
 0x4a9   : > { %803 = vst.msk [vmem:[#allocation4] sm:$0xf] %vm432_vm10, %v802_v54 }
 0x4b0   : > { %v804_v55 = vld [vmem:[#allocation4] sm:$0xf] }
 0x4b1   : > { %805 = vst.msk [vmem:[%s210_s24] sm:$0xf] %vm432_vm10, %v804_v55 }
 0x4b2   : > { %1085 = shalt.err (!%p1082_p5)
}
 0x4b3   : > { %s1086_s9 = scalar_lea.hbm %s1362_s5, 64  ;;  %s1090_s13 = scalar_lea.hbm %s1407_s4, 128 }
 0x4b4   : > { %p1087_p6 = scmp.ne.s32.totalorder %s1362_s5, %s1086_s9  ;;  %p1091_p10 = scmp.lt.s32.totalorder %s1362_s5, %s1407_s4 }
 0x4b5   : > { %p1092_p11 = scmp.lt.s32.totalorder %s1090_s13, %s1086_s9 }
 0x4b6   : > { %p1088_p7 = pnand %p1087_p6, %p1223_p4 }
 0x4b7   : > { %p1093_p12 = por %p1092_p11, %p1091_p10 }
 0x4b8   : > { %p1089_p9 = pneg %p1088_p7 }
 0x4ba   : > { %p1094_p13 = pnand %p1093_p12, %p1089_p9 }
 0x4bc   : > { %1097 = shalt.err (!%p1094_p13)
}
 0x4bd   : > { %1002 = dma.vmem_to_hbm [thread:$0]  (%p1223_p4), %s822_s26, 64, %s1362_s5, %s807_s6  }
 0x4be PF: > { %p1008_p0 = scmp.ge.s32.totalorder %s1148_s20, 2  ;;  %s833_s22 = sand.u32 1, %s1128_s15  }
 0x4bf   : > { %s834_s24 = scalar_lea.sflag [#allocation6], %s833_s22 }
 0x4c0   : > { %p1005_p1 = pnand %p1008_p0, %p1230_p8 }
 0x4c2   : > { %p1006_p2 = pneg %p1005_p1 }
 0x4c4   : > { %1123 = dma.done.wait (%p1006_p2), %s834_s24, 64  }
 0x4c5   : > { %1125 = vsyncadd (%p1006_p2), %s834_s24, 4294967232  ;;  %s17_s20 = sadd.s32 1, %s1148_s20   ;;  %s1410_s15 = smov %s1132_s16 }
 0x4c6   : > { %p14_p3 = scmp.ge.s32.totalorder %s17_s20, 4   ;;  %s1411_s16 = smov %s1136_s17 }
 0x4c7   : > { %s1412_s17 = smov %s1236_s28  ;;  %s1413_s18 = smov %s1144_s19 }
 0x4c8   : > { %s1414_s19 = smov %s1416_s23  ;;  %16 = sbr.rel (!%p14_p3) target bundleno = 4 (0x4), region = 81 }
 0x4cd   :  { %839 = vsyncpa [#allocation6], 1 }
 0x4ce   :  { %841 = vsyncpa [#allocation6 + $0x1], 1 }

</bundles_post_ra>
